<compile_context>
chip_gen: v5e
topology: v5e:2x2
jax: 0.10.0
libtpu: 0.0.40
codegen_flags: <defaults>
</compile_context>

<pallas_src>
import jax
import jax.numpy as jnp
from jax.experimental import pallas as pl
from jax.experimental.pallas import tpu as pltpu

# ------------------------- logical model dims (small, synthetic) -----------------
N = 8         # batch
D_IN = 32     # encoder input features
HIDDEN = 32   # encoder output features
H1_OUT = 16   # header 1 output features
H2_OUT = 8    # header 2 output features

# ------------------------- padded (lane-dense) dims -------------------------------
LANE = 128
SUB = 8
N_P = max(SUB, ((N + SUB - 1) // SUB) * SUB)            # 8
D_IN_P = ((D_IN + LANE - 1) // LANE) * LANE             # 128
HIDDEN_P = ((HIDDEN + LANE - 1) // LANE) * LANE         # 128
HOUT = H1_OUT + H2_OUT                                  # 24 (fused header width)
HOUT_P = ((HOUT + LANE - 1) // LANE) * LANE             # 128


def _multiheader_kernel(x_ref, we_ref, be_ref, wh_ref, bh_ref, o_ref):
    """Fused encoder + (concatenated) headers, all full (8,128)-tile ops.

    x_ref : (N_P, D_IN_P)        VMEM  zero-padded input
    we_ref: (D_IN_P, HIDDEN_P)   VMEM  encoder weight (in, out), zero-padded
    be_ref: (1, HIDDEN_P)        VMEM  encoder bias, zero-padded
    wh_ref: (HIDDEN_P, HOUT_P)   VMEM  fused header weights [w1 | w2], zero-padded
    bh_ref: (1, HOUT_P)          VMEM  fused header bias   [b1 | b2], zero-padded
    o_ref : (N_P, HOUT_P)        VMEM  fused header outputs (lane-dense store)
    """
    x = x_ref[...]

    # encoder: z = relu(x @ We + be)   -- padded lanes stay exactly 0
    z = jnp.dot(x, we_ref[...], preferred_element_type=jnp.float32) + be_ref[...]
    z = jnp.maximum(z, 0.0)

    # fused headers: one MXU push, one bias add, one unmasked 128-lane store
    o_ref[...] = (jnp.dot(z, wh_ref[...], preferred_element_type=jnp.float32)
                  + bh_ref[...]).astype(o_ref.dtype)


def multiheader_forward(x, packed_params):
    """Runs the fused Pallas kernel. Returns a tuple (out_head1, out_head2)."""
    we_p, be_p, wh_p, bh_p = packed_params
    n = x.shape[0]

    # Zero-pad x to the lane-dense tile (8, 128); layout plumbing only.
    x_p = jnp.zeros((N_P, D_IN_P), jnp.float32).at[:n, :D_IN].set(x)

    full = lambda shape: pl.BlockSpec(shape, lambda: tuple(0 for _ in shape))

    flops = 2 * N_P * D_IN_P * HIDDEN_P + 2 * N_P * HIDDEN_P * HOUT_P
    bytes_accessed = 4 * (N_P * D_IN_P + D_IN_P * HIDDEN_P + HIDDEN_P
                          + HIDDEN_P * HOUT_P + HOUT_P + N_P * HOUT_P)

    out_fused = pl.pallas_call(
        _multiheader_kernel,
        out_shape=jax.ShapeDtypeStruct((N_P, HOUT_P), jnp.float32),
        grid=(),  # whole padded working set (~140 KiB) fits in VMEM; one shot
        in_specs=[
            full((N_P, D_IN_P)),
            full((D_IN_P, HIDDEN_P)),
            full((1, HIDDEN_P)),
            full((HIDDEN_P, HOUT_P)),
            full((1, HOUT_P)),
        ],
        out_specs=full((N_P, HOUT_P)),
        cost_estimate=pl.CostEstimate(
            flops=flops, transcendentals=0, bytes_accessed=bytes_accessed),
    )(x_p, we_p, be_p, wh_p, bh_p)

    # Split fused header output back into the module's tuple semantics.
    out1 = out_fused[:n, :H1_OUT]
    out2 = out_fused[:n, H1_OUT:H1_OUT + H2_OUT]
    return (out1, out2)


def init_params(key):
    """Deterministic parameter init (PyTorch Linear shapes, then transposed)."""
    ks = jax.random.split(key, 6)
    # PyTorch shapes: weight (out, in), bias (out,)
    we_pt = jax.random.normal(ks[0], (HIDDEN, D_IN), jnp.float32) * 0.1
    be_pt = jax.random.normal(ks[1], (HIDDEN,), jnp.float32) * 0.1
    w1_pt = jax.random.normal(ks[2], (H1_OUT, HIDDEN), jnp.float32) * 0.1
    b1_pt = jax.random.normal(ks[3], (H1_OUT,), jnp.float32) * 0.1
    w2_pt = jax.random.normal(ks[4], (H2_OUT, HIDDEN), jnp.float32) * 0.1
    b2_pt = jax.random.normal(ks[5], (H2_OUT,), jnp.float32) * 0.1

    # Glue: transpose to (in, out) and make biases 2D for lane layout.
    return (
        we_pt.T, be_pt.reshape(1, HIDDEN),
        w1_pt.T, b1_pt.reshape(1, H1_OUT),
        w2_pt.T, b2_pt.reshape(1, H2_OUT),
    )


def pack_params(params):
    """Fuse the header weights and zero-pad every lane dim to 128 (one-time glue)."""
    we, be, w1, b1, w2, b2 = params

    # Fuse headers along the output dimension: [w1 | w2], [b1 | b2].
    wh = jnp.concatenate([w1, w2], axis=1)          # (HIDDEN, HOUT)
    bh = jnp.concatenate([b1, b2], axis=1)          # (1, HOUT)

    we_p = jnp.zeros((D_IN_P, HIDDEN_P), jnp.float32).at[:D_IN, :HIDDEN].set(we)
    be_p = jnp.zeros((1, HIDDEN_P), jnp.float32).at[:, :HIDDEN].set(be)
    wh_p = jnp.zeros((HIDDEN_P, HOUT_P), jnp.float32).at[:HIDDEN, :HOUT].set(wh)
    bh_p = jnp.zeros((1, HOUT_P), jnp.float32).at[:, :HOUT].set(bh)
    return (we_p, be_p, wh_p, bh_p)


def reference_forward(x, params):
    """Pure-JAX reference mirroring MultiHeaderModel.forward semantics."""
    we, be, w1, b1, w2, b2 = params
    z = jnp.maximum(x @ we + be, 0.0)          # encoder(x)
    return (z @ w1 + b1, z @ w2 + b2)          # tuple of header outputs


if __name__ == "__main__":
    key = jax.random.PRNGKey(0)
    k_x, k_p = jax.random.split(key)
    x = jax.random.normal(k_x, (N, D_IN), jnp.float32)
    params = init_params(k_p)
    packed = pack_params(params)

    outs = multiheader_forward(x, packed)
    outs = jax.block_until_ready(outs)

    refs = reference_forward(x, params)
    for o, r in zip(outs, refs):
        assert o.shape == r.shape and o.dtype == r.dtype
        assert jnp.allclose(o, r, atol=1e-4, rtol=1e-4), "mismatch vs reference"

    print("KERNEL_OK")
</pallas_src>

<mosaic_0001>
module attributes {stable_mosaic.version = 11 : i64} {
  func.func @_multiheader_kernel(%arg0: memref<8x128xf32, #tpu.memory_space<vmem>>, %arg1: memref<128x128xf32, #tpu.memory_space<vmem>>, %arg2: memref<1x128xf32, #tpu.memory_space<vmem>>, %arg3: memref<128x128xf32, #tpu.memory_space<vmem>>, %arg4: memref<1x128xf32, #tpu.memory_space<vmem>>, %arg5: memref<8x128xf32, #tpu.memory_space<vmem>>) attributes {dimension_semantics = [], scalar_prefetch = 0 : i64, scratch_operands = 0 : i64, tpu.core_type = #tpu.core_type<tc>} {
    %c0 = arith.constant 0 : index
    %c0_0 = arith.constant 0 : index
    %0 = vector.load %arg0[%c0, %c0_0] : memref<8x128xf32, #tpu.memory_space<vmem>>, vector<8x128xf32>
    %c0_1 = arith.constant 0 : index
    %c0_2 = arith.constant 0 : index
    %1 = vector.load %arg1[%c0_1, %c0_2] : memref<128x128xf32, #tpu.memory_space<vmem>>, vector<128x128xf32>
    %cst = arith.constant dense<0.000000e+00> : vector<8x128xf32>
    %2 = tpu.matmul %0, %1, %cst {dimension_numbers = #tpu.dot_dimension_numbers<[1], [0], [0], [1], [0, 0, 1, 1], [], []>} : vector<8x128xf32>, vector<128x128xf32>, vector<8x128xf32> -> vector<8x128xf32>
    %c0_3 = arith.constant 0 : index
    %c0_4 = arith.constant 0 : index
    %3 = vector.load %arg2[%c0_3, %c0_4] : memref<1x128xf32, #tpu.memory_space<vmem>>, vector<1x128xf32>
    %4 = vector.broadcast %3 : vector<1x128xf32> to vector<8x128xf32>
    %5 = arith.addf %2, %4 : vector<8x128xf32>
    %cst_5 = arith.constant 0.000000e+00 : f32
    %6 = vector.broadcast %cst_5 : f32 to vector<8x128xf32>
    %7 = arith.maximumf %5, %6 : vector<8x128xf32>
    %c0_6 = arith.constant 0 : index
    %c0_7 = arith.constant 0 : index
    %8 = vector.load %arg3[%c0_6, %c0_7] : memref<128x128xf32, #tpu.memory_space<vmem>>, vector<128x128xf32>
    %cst_8 = arith.constant dense<0.000000e+00> : vector<8x128xf32>
    %9 = tpu.matmul %7, %8, %cst_8 {dimension_numbers = #tpu.dot_dimension_numbers<[1], [0], [0], [1], [0, 0, 1, 1], [], []>} : vector<8x128xf32>, vector<128x128xf32>, vector<8x128xf32> -> vector<8x128xf32>
    %c0_9 = arith.constant 0 : index
    %c0_10 = arith.constant 0 : index
    %10 = vector.load %arg4[%c0_9, %c0_10] : memref<1x128xf32, #tpu.memory_space<vmem>>, vector<1x128xf32>
    %11 = vector.broadcast %10 : vector<1x128xf32> to vector<8x128xf32>
    %12 = arith.addf %9, %11 : vector<8x128xf32>
    %c0_11 = arith.constant 0 : index
    %c0_12 = arith.constant 0 : index
    %13 = vector.load %arg5[%c0_11, %c0_12] : memref<8x128xf32, #tpu.memory_space<vmem>>, vector<8x128xf32>
    tpu.vector_store %arg5[%c0_11, %c0_12], %12 {strides = array<i32>} : memref<8x128xf32, #tpu.memory_space<vmem>>, vector<8x128xf32>,
    return
  }
}

</mosaic_0001>

<bundles_post_ra>
// kernel: tpu_custom_call.1
= control target key start
LH: loop header
LB: loop body
LE: loop exit
PB: predicated region body
PF: predicated region fallthrough
CT: control target
= control target key end

     0   :  { %10 = vsyncpa [#allocation3], 0  ;;  %s331_s0 = inlined_call_operand.hbm [shape: f32[8,128], index: 0, kind: input, shape index: {}]   ;;  %s332_s1 = inlined_call_operand.hbm [shape: f32[128,128], index: 1, kind: input, shape index: {}]   ;;  %s333_s2 = inlined_call_operand.vmem [shape: f32[1,128], index: 2, kind: input, shape index: {}]   ;;  %s334_s3 = inlined_call_operand.hbm [shape: f32[128,128], index: 3, kind: input, shape index: {}]   ;;  %s335_s4 = inlined_call_operand.vmem [shape: f32[1,128], index: 4, kind: input, shape index: {}]   ;;  %s336_s5 = inlined_call_operand.hbm [shape: f32[8,128], index: 5, kind: output, shape index: {}]  }
   0x1   :  { %11 = vsyncpa [#allocation6], 0  ;;  %s28_s20 = sshll.u32 %s332_s1, 4  ;;  %s29_s20 = int_to_ptr.hbm [resolvable:$true] %s28_s20 }
   0x2   :  { %12 = vsyncpa [#allocation4], 0  ;;  %s277_s21 = smov [#allocation5]   ;;  %s18_s25 = sshll.u32 %s331_s0, 4  ;;  %s19_s25 = int_to_ptr.hbm [resolvable:$true] %s18_s25 }
   0x3   :  { %s30_s22 = sshll.u32 %s277_s21, 4  ;;  %s278_s26 = smov 128   ;;  %s31_s22 = int_to_ptr.vmem [resolvable:$true] %s30_s22 }
   0x4   :  { %s279_s27 = smov 8   ;;  %s280_s28 = smov [#allocation2]  }
   0x5   :  { %36 = dma.hbm_to_vmem [thread:$0]  %s29_s20, 2048, %s31_s22, [#allocation6], %s278_s26, %s278_s26, %s279_s27  }
   0x6   :  { %s20_s29 = sshll.u32 %s280_s28, 4  ;;  %s43_s7 = sshll.u32 %s334_s3, 4  ;;  %s21_s29 = int_to_ptr.vmem [resolvable:$true] %s20_s29  ;;  %s44_s7 = int_to_ptr.hbm [resolvable:$true] %s43_s7 }
   0x7   :  { %23 = dma.hbm_to_vmem [thread:$0]  %s19_s25, 128, %s21_s29, [#allocation3]  }
   0x8   :  { %s281_s1 = smov [#allocation7]  }
   0x9   :  { %s45_s8 = sshll.u32 %s281_s1, 4  ;;  %s46_s8 = int_to_ptr.vmem [resolvable:$true] %s45_s8 }
   0xa   :  { %51 = dma.hbm_to_vmem [thread:$0]  %s44_s7, 2048, %s46_s8, [#allocation6], %s278_s26, %s278_s26, %s279_s27  }
   0xb   :  { %271 = dma.done.wait [#allocation3], 128  }
   0xc   :  { %272 = vsyncadd [#allocation3], 4294967168 }
   0xd   :  { %273 = dma.done.wait [#allocation6], 4096  }
   0xe   :  { %274 = vsyncadd [#allocation6], 4294963200  ;;  %v82_v0 = vld [vmem:[#allocation5 + $0x78] sm:$0xff]  ;;  %v81_v1 = vld [vmem:[#allocation5 + $0x70] sm:$0xff]  ;;  %s282_s11 = smov [#allocation8]   ;;  %s156_s15 = sshll.u32 %s336_s5, 4  ;;  %s157_s15 = int_to_ptr.hbm [resolvable:$true] %s156_s15 }
   0xf   :  { %87 = vmatpush.msra.mxu0 %v82_v0  ;;  %v80_v2 = vld [vmem:[#allocation5 + $0x68] sm:$0xff]  ;;  %v79_v3 = vld [vmem:[#allocation5 + $0x60] sm:$0xff]  ;;  %v123_v4 = vld [vmem:[#allocation7 + $0x78] sm:$0xff]  ;;  %s154_s12 = sshll.u32 %s282_s11, 4  ;;  %s155_s12 = int_to_ptr.vmem [resolvable:$true] %s154_s12 }
  0x10   :  { %v78_v5 = vld [vmem:[#allocation5 + $0x58] sm:$0xff]  ;;  %128 = vmatpush.msra.mxu1 %v123_v4  ;;  %v122_v6 = vld [vmem:[#allocation7 + $0x70] sm:$0xff]  ;;  %v121_v7 = vld [vmem:[#allocation7 + $0x68] sm:$0xff] }
  0x11   :  { %88 = vmatpush.msra.mxu0 %v81_v1  ;;  %v77_v8 = vld [vmem:[#allocation5 + $0x50] sm:$0xff]  ;;  %v120_v9 = vld [vmem:[#allocation7 + $0x60] sm:$0xff]  ;;  %v76_v10 = vld [vmem:[#allocation5 + $0x48] sm:$0xff] }
  0x12   :  { %129 = vmatpush.msra.mxu1 %v122_v6  ;;  %v119_v11 = vld [vmem:[#allocation7 + $0x58] sm:$0xff]  ;;  %v75_v12 = vld [vmem:[#allocation5 + $0x40] sm:$0xff]  ;;  %v118_v13 = vld [vmem:[#allocation7 + $0x50] sm:$0xff] }
  0x13   :  { %89 = vmatpush.msra.mxu0 %v80_v2  ;;  %v74_v14 = vld [vmem:[#allocation5 + $0x38] sm:$0xff]  ;;  %v117_v15 = vld [vmem:[#allocation7 + $0x48] sm:$0xff]  ;;  %v73_v16 = vld [vmem:[#allocation5 + $0x30] sm:$0xff] }
  0x14   :  { %130 = vmatpush.msra.mxu1 %v121_v7  ;;  %v116_v17 = vld [vmem:[#allocation7 + $0x40] sm:$0xff]  ;;  %v72_v18 = vld [vmem:[#allocation5 + $0x28] sm:$0xff]  ;;  %v115_v19 = vld [vmem:[#allocation7 + $0x38] sm:$0xff] }
  0x15   :  { %90 = vmatpush.msra.mxu0 %v79_v3  ;;  %v71_v20 = vld [vmem:[#allocation5 + $0x20] sm:$0xff]  ;;  %v114_v21 = vld [vmem:[#allocation7 + $0x30] sm:$0xff]  ;;  %v70_v22 = vld [vmem:[#allocation5 + $0x18] sm:$0xff] }
  0x16   :  { %131 = vmatpush.msra.mxu1 %v120_v9  ;;  %v113_v23 = vld [vmem:[#allocation7 + $0x28] sm:$0xff]  ;;  %v69_v24 = vld [vmem:[#allocation5 + $0x10] sm:$0xff]  ;;  %v112_v25 = vld [vmem:[#allocation7 + $0x20] sm:$0xff] }
  0x17   :  { %91 = vmatpush.msra.mxu0 %v78_v5  ;;  %v68_v26 = vld [vmem:[#allocation5 + $0x8] sm:$0xff]  ;;  %v111_v27 = vld [vmem:[#allocation7 + $0x18] sm:$0xff]  ;;  %v67_v28 = vld [vmem:[#allocation5] sm:$0xff] }
  0x18   :  { %132 = vmatpush.msra.mxu1 %v119_v11  ;;  %v66_v29 = vld [vmem:[#allocation2] sm:$0xff]  ;;  %v110_v30 = vld [vmem:[#allocation7 + $0x10] sm:$0xff]  ;;  %v109_v31 = vld [vmem:[#allocation7 + $0x8] sm:$0xff] }
  0x19   :  { %92 = vmatpush.msra.mxu0 %v77_v8  ;;  %v108_v32 = vld [vmem:[#allocation7] sm:$0xff]  ;;  %v173_v33 = vld [vmem:[%s333_s2] ss:$0 sm:$0xff] }
  0x1a   :  { %133 = vmatpush.msra.mxu1 %v118_v13  ;;  %v174_v37 = vld [vmem:[%s335_s4] ss:$0 sm:$0xff] }
  0x1b   :  { %93 = vmatpush.msra.mxu0 %v76_v10 }
  0x1c   :  { %134 = vmatpush.msra.mxu1 %v117_v15 }
  0x1d   :  { %94 = vmatpush.msra.mxu0 %v75_v12 }
  0x1e   :  { %135 = vmatpush.msra.mxu1 %v116_v17 }
  0x1f   :  { %95 = vmatpush.msra.mxu0 %v74_v14 }
  0x20   :  { %136 = vmatpush.msra.mxu1 %v115_v19 }
  0x21   :  { %96 = vmatpush.msra.mxu0 %v73_v16 }
  0x22   :  { %137 = vmatpush.msra.mxu1 %v114_v21 }
  0x23   :  { %97 = vmatpush.msra.mxu0 %v72_v18 }
  0x24   :  { %138 = vmatpush.msra.mxu1 %v113_v23 }
  0x25   :  { %98 = vmatpush.msra.mxu0 %v71_v20 }
  0x26   :  { %139 = vmatpush.msra.mxu1 %v112_v25 }
  0x27   :  { %99 = vmatpush.msra.mxu0 %v70_v22 }
  0x28   :  { %140 = vmatpush.msra.mxu1 %v111_v27 }
  0x29   :  { %100 = vmatpush.msra.mxu0 %v69_v24 }
  0x2a   :  { %141 = vmatpush.msra.mxu1 %v110_v30 }
  0x2b   :  { %101 = vmatpush.msra.mxu0 %v68_v26 }
  0x2c   :  { %142 = vmatpush.msra.mxu1 %v109_v31 }
  0x2d   :  { %102 = vmatpush.msra.mxu0 %v67_v28 }
  0x2e   :  { %103 = vmatmul.f32.vlgmr.msra.gmra.mxu0 %v66_v29  ;;  %143 = vmatpush.msra.mxu1 %v108_v32 }
  0xab   :  { %v104_v34 = vpop.f32.mrf.mxu0 }
  0xac   :  { %v105_v35 = vadd.f32 %v173_v33, %v104_v34 }
  0xae   :  { %v107_v36 = vmax.f32 %v105_v35, 0.0 }
  0xb0   :  { %144 = vmatmul.f32.vlgmr.msra.gmra.mxu1 %v107_v36 }
 0x12d   :  { %v145_v38 = vpop.f32.mrf.mxu1 }
 0x12e   :  { %v146_v39 = vadd.f32 %v174_v37, %v145_v38 }
 0x130   :  { %148 = vst [vmem:[#allocation8] sm:$0xff] %v146_v39 }
 0x131   :  { %159 = dma.vmem_to_hbm [thread:$0]  %s155_s12, 128, %s157_s15, [#allocation4]  }
 0x132   :  { %275 = dma.done.wait [#allocation4], 128  }
 0x133   :  { %276 = vsyncadd [#allocation4], 4294967168 }
 0x134   :  { %164 = vsyncpa [#allocation3], 1 }
 0x135   :  { %165 = vsyncpa [#allocation6], 1 }
 0x136   :  { %166 = vsyncpa [#allocation4], 1 }

</bundles_post_ra>
